<compile_context>
chip_gen: v5e
topology: v5e:2x2
jax: 0.10.0
libtpu: 0.0.40
codegen_flags: <defaults>
</compile_context>

<pallas_src>
import jax
import jax.numpy as jnp
from jax.experimental import pallas as pl
from jax.experimental.pallas import tpu as pltpu

EPS = 1e-5
_MIB = 1024 * 1024


def _add_norm_kernel(x1_ref, x2_ref, w_ref, b_ref, o_ref):
    # x1_ref, x2_ref, o_ref : (TB, N, TE) data block for this grid step
    # w_ref, b_ref          : (1, E//TE, TE) full affine params (VMEM-resident)
    e = pl.program_id(1)

    # Stats in f32 regardless of input dtype (matches InstanceNorm1d accuracy;
    # no-op casts for f32 inputs).
    added = x1_ref[...].astype(jnp.float32) + x2_ref[...].astype(jnp.float32)
    mean = jnp.mean(added, axis=1, keepdims=True)                # (TB, 1, TE)
    centered = added - mean
    var = jnp.mean(centered * centered, axis=1, keepdims=True)   # biased var
    inv = jax.lax.rsqrt(var + EPS)

    w = w_ref[:, pl.ds(e, 1), :].astype(jnp.float32)             # (1, 1, TE)
    b = b_ref[:, pl.ds(e, 1), :].astype(jnp.float32)
    o_ref[...] = (centered * (inv * w) + b).astype(o_ref.dtype)


def _vmem_capacity_bytes():
    """Physical VMEM of the attached TPU; conservative fallback if unknown."""
    try:
        return int(pltpu.get_tpu_info().vmem_capacity_bytes)
    except Exception:
        return 64 * _MIB  # v7x per-TensorCore size -- smallest of the fleet


def _divisors_desc(n):
    return [d for d in range(n, 0, -1) if n % d == 0]


def _select_tiles(B, N, E, itemsize, blk_budget):
    """Pick (TB, TE) for blocks of shape (TB, N, TE).

    Working-set estimate per grid step: 8 * TB * N * TE * itemsize
    (= 3 I/O arrays x 2 pipeline buffers + ~2 blocks of in-kernel f32 temps).
    """
    def ws(tb, te):
        return 8 * tb * N * te * itemsize

    # --- E tile -------------------------------------------------------------
    if E % 128 != 0:
        # Lane-sparse path (e.g. tiny embedding dims): the block's last two dims
        # must equal the full (N, E), so only the batch dim can be split.
        te = E
    elif ws(1, E) <= blk_budget:
        te = E                       # fully contiguous DMAs
    else:
        te = 0
        for cand in range(E, 127, -128):
            if E % cand == 0 and ws(1, cand) <= blk_budget:
                te = cand
                break
        if te == 0:
            # TODO(synk): for very large N even a TE=128 block exceeds the VMEM
            # budget; the proper fix is an extra "arbitrary" N grid axis with
            # sum/sum^2 scratch accumulators and a second output pass.
            te = 128

    # --- batch folding --------------------------------------------------------
    tb = 1
    for d in _divisors_desc(B):
        if ws(d, te) > blk_budget:
            continue
        # Keep at least one parallel grid axis with extent >= 2 so both
        # TensorCores stream HBM on megacore parts (v7x); skip this constraint
        # on the tiny lane-sparse path where per-step overhead dominates.
        if d == B and B > 1 and E % 128 == 0 and (E // te) == 1:
            continue
        tb = d
        break

    # If everything collapsed to a single (large) grid step and E can be split
    # into >= 2 lane-dense tiles, split E so both TensorCores get work.
    if (B // tb) == 1 and (E // te) == 1 and E % 256 == 0 and ws(tb, te) >= 2 * _MIB:
        te = E // 2

    return tb, te


def add_and_normalize(input1, input2, weight, bias, tb=None, te=None):
    """input1, input2: (B, N, E); weight, bias: (E,). InstanceNorm over N."""
    B, N, E = input1.shape
    itemsize = jnp.dtype(input1.dtype).itemsize

    cap = _vmem_capacity_bytes()
    vmem_cap = (3 * cap) // 4            # ask the compiler for at most ~75%
    blk_budget = (17 * vmem_cap) // 20   # ~85% of that for the block working set

    auto_tb, auto_te = _select_tiles(B, N, E, itemsize, blk_budget)
    TB = tb if tb is not None else auto_tb
    TE = te if te is not None else auto_te
    assert B % TB == 0 and E % TE == 0, (TB, TE)
    Et = E // TE
    grid = (B // TB, Et)

    # Affine params pre-shaped to (1, E//TE, TE): one tiny full-array block with
    # a constant index_map -> DMA'd once and VMEM-resident for the whole grid.
    w3 = weight.reshape(1, Et, TE).astype(input1.dtype)
    b3 = bias.reshape(1, Et, TE).astype(input1.dtype)

    blk_bytes = TB * N * TE * itemsize
    ws_bytes = 8 * blk_bytes + 2 * E * itemsize
    vmem_limit = max(32 * _MIB, ws_bytes + ws_bytes // 4)   # ~1.25x headroom
    if ws_bytes <= vmem_cap:
        vmem_limit = min(vmem_limit, vmem_cap)
    else:
        # Degenerate huge-N case (see TODO in _select_tiles): request nearly all
        # of VMEM rather than silently under-provisioning.
        vmem_limit = min(vmem_limit, (cap * 49) // 50)

    return pl.pallas_call(
        _add_norm_kernel,
        out_shape=jax.ShapeDtypeStruct((B, N, E), input1.dtype),
        grid_spec=pltpu.PrefetchScalarGridSpec(
            num_scalar_prefetch=0,
            grid=grid,
            in_specs=[
                pl.BlockSpec((TB, N, TE), lambda b, e: (b, 0, e)),
                pl.BlockSpec((TB, N, TE), lambda b, e: (b, 0, e)),
                pl.BlockSpec((1, Et, TE), lambda b, e: (0, 0, 0)),
                pl.BlockSpec((1, Et, TE), lambda b, e: (0, 0, 0)),
            ],
            out_specs=pl.BlockSpec((TB, N, TE), lambda b, e: (b, 0, e)),
        ),
        compiler_params=pltpu.CompilerParams(
            dimension_semantics=("parallel", "parallel"),
            vmem_limit_bytes=int(vmem_limit),
        ),
    )(input1, input2, w3, b3)


def reference(input1, input2, weight, bias):
    added = input1 + input2
    mean = jnp.mean(added, axis=1, keepdims=True)
    var = jnp.mean((added - mean) ** 2, axis=1, keepdims=True)
    return (added - mean) * jax.lax.rsqrt(var + EPS) * weight.reshape(1, 1, -1) \
        + bias.reshape(1, 1, -1)


if __name__ == "__main__":
    key = jax.random.PRNGKey(0)
    k1, k2, k3, k4 = jax.random.split(key, 4)

    # 1) Module-consistent small shapes: batch=2, seq=8, embedding_dim=32.
    #    E < 128 -> single (B, N, E) block, 1-step grid.
    B, N, E = 2, 8, 32
    input1 = jax.random.normal(k1, (B, N, E), dtype=jnp.float32)
    input2 = jax.random.normal(k2, (B, N, E), dtype=jnp.float32)
    weight = 1.0 + 0.1 * jax.random.normal(k3, (E,), dtype=jnp.float32)
    bias = 0.1 * jax.random.normal(k4, (E,), dtype=jnp.float32)
    out = jax.block_until_ready(add_and_normalize(input1, input2, weight, bias))
    ref = reference(input1, input2, weight, bias)
    assert out.shape == (B, N, E)
    assert jnp.allclose(out, ref, atol=1e-5, rtol=1e-5), "mismatch (E<128 path)"

    # 2) Lane-dense multi-E-tile path (forced TE=128): grid (2, 2); exercises the
    #    resident-weight dynamic slice with e > 0.
    B2, N2, E2 = 2, 16, 256
    a1 = jax.random.normal(k1, (B2, N2, E2), dtype=jnp.float32)
    a2 = jax.random.normal(k2, (B2, N2, E2), dtype=jnp.float32)
    w2 = 1.0 + 0.1 * jax.random.normal(k3, (E2,), dtype=jnp.float32)
    bs2 = 0.1 * jax.random.normal(k4, (E2,), dtype=jnp.float32)
    out2 = jax.block_until_ready(add_and_normalize(a1, a2, w2, bs2, tb=1, te=128))
    assert jnp.allclose(out2, reference(a1, a2, w2, bs2), atol=1e-5, rtol=1e-5), \
        "mismatch (tiled E)"

    # 3) Auto path with batch folding: TE=E (contiguous DMAs), TB=2, grid (2, 1).
    B3, N3, E3 = 4, 64, 256
    c1 = jax.random.normal(k1, (B3, N3, E3), dtype=jnp.float32)
    c2 = jax.random.normal(k2, (B3, N3, E3), dtype=jnp.float32)
    w3_ = 1.0 + 0.1 * jax.random.normal(k3, (E3,), dtype=jnp.float32)
    b3_ = 0.1 * jax.random.normal(k4, (E3,), dtype=jnp.float32)
    out3 = jax.block_until_ready(add_and_normalize(c1, c2, w3_, b3_))
    assert jnp.allclose(out3, reference(c1, c2, w3_, b3_), atol=1e-5, rtol=1e-5), \
        "mismatch (batch-folded)"

    print("KERNEL_OK")
</pallas_src>

<mosaic_0001>
module attributes {stable_mosaic.version = 11 : i64} {
  func.func @_add_norm_kernel(%arg0: i32, %arg1: i32, %arg2: memref<2x8x32xf32, #tpu.memory_space<vmem>>, %arg3: memref<2x8x32xf32, #tpu.memory_space<vmem>>, %arg4: memref<1x1x32xf32, #tpu.memory_space<vmem>>, %arg5: memref<1x1x32xf32, #tpu.memory_space<vmem>>, %arg6: memref<2x8x32xf32, #tpu.memory_space<vmem>>) attributes {dimension_semantics = [#tpu.dimension_semantics<parallel>, #tpu.dimension_semantics<parallel>], iteration_bounds = array<i64: 1, 1>, scalar_prefetch = 0 : i64, scratch_operands = 0 : i64, tpu.core_type = #tpu.core_type<tc>, window_params = [{transform_indices = @transform_0, window_bounds = array<i64: 2, 8, 32>}, {transform_indices = @transform_1, window_bounds = array<i64: 2, 8, 32>}, {pipeline_mode = #tpu.pipeline_mode<synchronous>, transform_indices = @transform_2, window_bounds = array<i64: 1, 1, 32>}, {pipeline_mode = #tpu.pipeline_mode<synchronous>, transform_indices = @transform_3, window_bounds = array<i64: 1, 1, 32>}, {transform_indices = @transform_4, window_bounds = array<i64: 2, 8, 32>}]} {
    %c0 = arith.constant 0 : index
    %c0_0 = arith.constant 0 : index
    %c0_1 = arith.constant 0 : index
    %0 = vector.load %arg2[%c0, %c0_0, %c0_1] : memref<2x8x32xf32, #tpu.memory_space<vmem>>, vector<2x8x32xf32>
    %c0_2 = arith.constant 0 : index
    %c0_3 = arith.constant 0 : index
    %c0_4 = arith.constant 0 : index
    %1 = vector.load %arg3[%c0_2, %c0_3, %c0_4] : memref<2x8x32xf32, #tpu.memory_space<vmem>>, vector<2x8x32xf32>
    %2 = arith.addf %0, %1 : vector<2x8x32xf32>
    %cst = arith.constant dense<0.000000e+00> : vector<2x32xf32>
    %3 = vector.multi_reduction <add>, %2, %cst [1] : vector<2x8x32xf32> to vector<2x32xf32>
    %4 = vector.shape_cast %3 : vector<2x32xf32> to vector<2x1x32xf32>
    %cst_5 = arith.constant 8.000000e+00 : f32
    %5 = vector.broadcast %cst_5 : f32 to vector<2x1x32xf32>
    %6 = arith.divf %4, %5 : vector<2x1x32xf32>
    %7 = vector.broadcast %6 : vector<2x1x32xf32> to vector<2x8x32xf32>
    %8 = arith.subf %2, %7 : vector<2x8x32xf32>
    %9 = arith.mulf %8, %8 : vector<2x8x32xf32>
    %cst_6 = arith.constant dense<0.000000e+00> : vector<2x32xf32>
    %10 = vector.multi_reduction <add>, %9, %cst_6 [1] : vector<2x8x32xf32> to vector<2x32xf32>
    %11 = vector.shape_cast %10 : vector<2x32xf32> to vector<2x1x32xf32>
    %cst_7 = arith.constant 8.000000e+00 : f32
    %12 = vector.broadcast %cst_7 : f32 to vector<2x1x32xf32>
    %13 = arith.divf %11, %12 : vector<2x1x32xf32>
    %cst_8 = arith.constant 9.99999974E-6 : f32
    %14 = vector.broadcast %cst_8 : f32 to vector<2x1x32xf32>
    %15 = arith.addf %13, %14 : vector<2x1x32xf32>
    %16 = math.rsqrt %15 : vector<2x1x32xf32>
    %c0_9 = arith.constant 0 : index
    %17 = arith.index_cast %arg1 : i32 to index
    %c0_10 = arith.constant 0 : index
    %18 = vector.load %arg4[%c0_9, %17, %c0_10] : memref<1x1x32xf32, #tpu.memory_space<vmem>>, vector<1x1x32xf32>
    %c0_11 = arith.constant 0 : index
    %19 = arith.index_cast %arg1 : i32 to index
    %c0_12 = arith.constant 0 : index
    %20 = vector.load %arg5[%c0_11, %19, %c0_12] : memref<1x1x32xf32, #tpu.memory_space<vmem>>, vector<1x1x32xf32>
    %21 = vector.broadcast %18 : vector<1x1x32xf32> to vector<2x1x32xf32>
    %22 = arith.mulf %16, %21 : vector<2x1x32xf32>
    %23 = vector.broadcast %22 : vector<2x1x32xf32> to vector<2x8x32xf32>
    %24 = arith.mulf %8, %23 : vector<2x8x32xf32>
    %25 = vector.broadcast %20 : vector<1x1x32xf32> to vector<2x8x32xf32>
    %26 = arith.addf %24, %25 : vector<2x8x32xf32>
    %c0_13 = arith.constant 0 : index
    %c0_14 = arith.constant 0 : index
    %c0_15 = arith.constant 0 : index
    %27 = vector.load %arg6[%c0_13, %c0_14, %c0_15] : memref<2x8x32xf32, #tpu.memory_space<vmem>>, vector<2x8x32xf32>
    tpu.vector_store %arg6[%c0_13, %c0_14, %c0_15], %26 {strides = array<i32>} : memref<2x8x32xf32, #tpu.memory_space<vmem>>, vector<2x8x32xf32>,
    return
  }
  func.func @transform_0(%arg0: i32, %arg1: i32) -> (i32, i32, i32) {
    %c0_i32 = arith.constant 0 : i32
    %c0_i32_0 = arith.constant 0 : i32
    return %arg0, %c0_i32, %arg1 : i32, i32, i32
  }
  func.func @transform_1(%arg0: i32, %arg1: i32) -> (i32, i32, i32) {
    %c0_i32 = arith.constant 0 : i32
    %c0_i32_0 = arith.constant 0 : i32
    return %arg0, %c0_i32, %arg1 : i32, i32, i32
  }
  func.func @transform_2(%arg0: i32, %arg1: i32) -> (i32, i32, i32) {
    %c0_i32 = arith.constant 0 : i32
    %c0_i32_0 = arith.constant 0 : i32
    %c0_i32_1 = arith.constant 0 : i32
    %c0_i32_2 = arith.constant 0 : i32
    return %c0_i32, %c0_i32_0, %c0_i32_1 : i32, i32, i32
  }
  func.func @transform_3(%arg0: i32, %arg1: i32) -> (i32, i32, i32) {
    %c0_i32 = arith.constant 0 : i32
    %c0_i32_0 = arith.constant 0 : i32
    %c0_i32_1 = arith.constant 0 : i32
    %c0_i32_2 = arith.constant 0 : i32
    return %c0_i32, %c0_i32_0, %c0_i32_1 : i32, i32, i32
  }
  func.func @transform_4(%arg0: i32, %arg1: i32) -> (i32, i32, i32) {
    %c0_i32 = arith.constant 0 : i32
    %c0_i32_0 = arith.constant 0 : i32
    return %arg0, %c0_i32, %arg1 : i32, i32, i32
  }
}

</mosaic_0001>

<bundles_post_ra>
// kernel: tpu_custom_call.1
= control target key start
LH: loop header
LB: loop body
LE: loop exit
PB: predicated region body
PF: predicated region fallthrough
CT: control target
= control target key end

     0   :  { %9 = vsyncpa [#allocation3], 0  ;;  %s309_s0 = inlined_call_operand.hbm [shape: f32[2,8,32], index: 0, kind: input, shape index: {}]   ;;  %s310_s1 = inlined_call_operand.hbm [shape: f32[2,8,32], index: 1, kind: input, shape index: {}]   ;;  %s311_s2 = inlined_call_operand.vmem [shape: f32[1,1,32], index: 2, kind: input, shape index: {}]   ;;  %s312_s3 = inlined_call_operand.vmem [shape: f32[1,1,32], index: 3, kind: input, shape index: {}]   ;;  %s313_s4 = inlined_call_operand.hbm [shape: f32[2,8,32], index: 4, kind: output, shape index: {}]  }
   0x1   :  { %10 = vsyncpa [#allocation6], 0 }
   0x2   :  { %11 = vsyncpa [#allocation4], 0  ;;  %s16_s17 = sshll.u32 %s309_s0, 4  ;;  %s248_s18 = smov [#allocation2]   ;;  %s17_s17 = int_to_ptr.hbm [resolvable:$true] %s16_s17 }
   0x3   :  { %s18_s19 = sshll.u32 %s248_s18, 4  ;;  %s29_s22 = sshll.u32 %s310_s1, 4  ;;  %s19_s19 = int_to_ptr.vmem [resolvable:$true] %s18_s19  ;;  %s30_s22 = int_to_ptr.hbm [resolvable:$true] %s29_s22 }
   0x4   :  { %s249_s23 = smov 128   ;;  %s250_s24 = smov 8  }
   0x5   :  { %24 = dma.hbm_to_vmem [thread:$0]  %s17_s17, 256, %s19_s19, [#allocation3], %s249_s23, %s249_s23, %s250_s24  }
   0x6   :  { %s251_s25 = smov [#allocation5]  }
   0x7   :  { %s31_s26 = sshll.u32 %s251_s25, 4  ;;  %s32_s26 = int_to_ptr.vmem [resolvable:$true] %s31_s26 }
   0x8   :  { %37 = dma.hbm_to_vmem [thread:$0]  %s30_s22, 256, %s32_s26, [#allocation6], %s249_s23, %s249_s23, %s250_s24  }
   0x9   :  { %242 = dma.done.wait [#allocation3], 256  }
   0xa   :  { %243 = vsyncadd [#allocation3], 4294967040 }
   0xb   :  { %244 = dma.done.wait [#allocation6], 256  }
   0xc   :  { %245 = vsyncadd [#allocation6], 4294967040  ;;  %v252_v0 = vmov 8.0   ;;  %v50_v2 = vld [vmem:[#allocation2] sm:$0xff]  ;;  %v52_v3 = vld [vmem:[#allocation5] sm:$0xff]  ;;  %vm56_vm0 = vcmask 261120  }
   0xd   :  { %164 = vrcp.f32 %v252_v0  ;;  %v54_v4 = vadd.f32 %v52_v3, %v50_v2  ;;  %v51_v6 = vld [vmem:[#allocation2 + $0x8] sm:$0xff]  ;;  %v53_v7 = vld [vmem:[#allocation5 + $0x8] sm:$0xff]  ;;  %v122_v62 = vld [vmem:[%s311_s2] sm:$0x1]  ;;  %s253_s29 = smov [#allocation7]   ;;  %s143_s7 = sshll.u32 %s313_s4, 4  ;;  %s144_s7 = int_to_ptr.hbm [resolvable:$true] %s143_s7 }
   0xe   :  { %v55_v8 = vadd.f32 %v53_v7, %v51_v6  ;;  %s141_s30 = sshll.u32 %s253_s29, 4  ;;  %s142_s30 = int_to_ptr.vmem [resolvable:$true] %s141_s30 }
   0xf   :  { %v57_v9 = vsel %vm56_vm0, %v54_v4, 0.0 }
  0x10   :  { %v58_v11 = vrot.slane %v57_v9, 4  ;;  %v64_v12 = vsel %vm56_vm0, %v55_v8, 0.0 }
  0x11   :  { %v65_v14 = vrot.slane %v64_v12, 4 }
  0x12   :  { %v59_v15 = vadd.f32 %v58_v11, %v57_v9 }
  0x13   :  { %v165_v1 = vpop.eup %164  ;;  %v66_v16 = vadd.f32 %v65_v14, %v64_v12 }
  0x14   :  { %v72_v5 = vmul.f32 8.0, %v165_v1  ;;  %v60_v17 = vrot.slane %v59_v15, 2  ;;  %vm76_vm1 = vweird.f32 %v165_v1 }
  0x15   :  { %v67_v19 = vrot.slane %v66_v16, 2 }
  0x16   :  { %v73_v10 = vsub.f32 1.0, %v72_v5  ;;  %v61_v20 = vadd.f32 %v60_v17, %v59_v15  ;;  %v163_v5 = vld [vmem:[%s312_s3] ss:$0 sm:$0xff] }
  0x17   :  { %v68_v21 = vadd.f32 %v67_v19, %v66_v16 }
  0x18   :  { %v74_v13 = vmul.f32 %v165_v1, %v73_v10  ;;  %v62_v22 = vrot.slane %v61_v20, 1 }
  0x19   :  { %v69_v24 = vrot.slane %v68_v21, 1 }
  0x1a   :  { %v75_v18 = vadd.f32 %v165_v1, %v74_v13  ;;  %v63_v25 = vadd.f32 %v62_v22, %v61_v20 }
  0x1b   :  { %v70_v26 = vadd.f32 %v69_v24, %v68_v21 }
  0x1c   :  { %v77_v23 = vsel %vm76_vm1, %v165_v1, %v75_v18 }
  0x1d   :  { %v78_v27 = vmul.f32 %v77_v23, %v63_v25  ;;  %v79_v28 = vmul.f32 %v77_v23, %v70_v26 }
  0x1f   :  { %v80_v29 = vsub.f32 %v54_v4, %v78_v27  ;;  %v81_v30 = vsub.f32 %v55_v8, %v79_v28 }
  0x21   :  { %v82_v31 = vmul.f32 %v80_v29, %v80_v29  ;;  %v83_v32 = vmul.f32 %v81_v30, %v81_v30 }
  0x23   :  { %v84_v33 = vsel %vm56_vm0, %v82_v31, 0.0  ;;  %v91_v35 = vsel %vm56_vm0, %v83_v32, 0.0 }
  0x24   :  { %v85_v34 = vrot.slane %v84_v33, 4  ;;  %v92_v36 = vrot.slane %v91_v35, 4 }
  0x26   :  { %v86_v37 = vadd.f32 %v85_v34, %v84_v33  ;;  %v93_v38 = vadd.f32 %v92_v36, %v91_v35 }
  0x28   :  { %v87_v39 = vrot.slane %v86_v37, 2  ;;  %v94_v40 = vrot.slane %v93_v38, 2 }
  0x2a   :  { %v88_v41 = vadd.f32 %v87_v39, %v86_v37  ;;  %v95_v42 = vadd.f32 %v94_v40, %v93_v38 }
  0x2c   :  { %v89_v43 = vrot.slane %v88_v41, 1  ;;  %v96_v44 = vrot.slane %v95_v42, 1 }
  0x2e   :  { %v90_v45 = vadd.f32 %v89_v43, %v88_v41  ;;  %v97_v46 = vadd.f32 %v96_v44, %v95_v42 }
  0x30   :  { %v98_v47 = vmul.f32 %v90_v45, %v77_v23  ;;  %v99_v48 = vmul.f32 %v97_v46, %v77_v23 }
  0x32   :  { %v100_v49 = vadd.f32 1e-05, %v98_v47  ;;  %v101_v50 = vadd.f32 1e-05, %v99_v48 }
  0x34   :  { %166 = vrsqrt.f32 %v100_v49  ;;  %vm108_vm2 = vweird.f32 %v100_v49  ;;  %vm118_vm4 = vweird.f32 %v101_v50 }
  0x35   :  { %168 = vrsqrt.f32 %v101_v50 }
  0x3a   :  { %v167_v51 = vpop.eup %166 }
  0x3b   :  { %v169_v52 = vpop.eup %168  ;;  %v103_v53 = vmul.f32 %v167_v51, %v100_v49  ;;  %vm109_vm3 = vweird.f32 %v167_v51 }
  0x3c   :  { %v113_v54 = vmul.f32 %v169_v52, %v101_v50  ;;  %vm119_vm5 = vweird.f32 %v169_v52  ;;  %vm110_vm6 = vmor %vm108_vm2, %vm109_vm3 }
  0x3d   :  { %v104_v55 = vmul.f32 %v167_v51, %v103_v53  ;;  %vm120_vm7 = vmor %vm118_vm4, %vm119_vm5 }
  0x3e   :  { %v114_v56 = vmul.f32 %v169_v52, %v113_v54 }
  0x3f   :  { %v105_v57 = vmul.f32 0.5, %v104_v55 }
  0x40   :  { %v115_v58 = vmul.f32 0.5, %v114_v56 }
  0x41   :  { %v106_v59 = vsub.f32 1.5, %v105_v57 }
  0x42   :  { %v116_v60 = vsub.f32 1.5, %v115_v58 }
  0x43   :  { %v107_v61 = vmul.f32 %v167_v51, %v106_v59 }
  0x44   :  { %v117_v63 = vmul.f32 %v169_v52, %v116_v60 }
  0x45   :  { %v111_v0 = vsel %vm110_vm6, %v167_v51, %v107_v61 }
  0x46   :  { %v124_v1 = vmul.f32 %v122_v62, %v111_v0  ;;  %v121_v2 = vsel %vm120_vm7, %v169_v52, %v117_v63 }
  0x47   :  { %v125_v3 = vmul.f32 %v122_v62, %v121_v2 }
  0x48   :  { %v126_v4 = vperm.slane %v124_v1, 0 }
  0x49   :  { %v127_v6 = vperm.slane %v125_v3, 0 }
  0x4a   :  { %v128_v7 = vmul.f32 %v126_v4, %v80_v29 }
  0x4b   :  { %v129_v8 = vmul.f32 %v127_v6, %v81_v30 }
  0x4c   :  { %v133_v9 = vadd.f32 %v163_v5, %v128_v7 }
  0x4d   :  { %v134_v10 = vadd.f32 %v163_v5, %v129_v8 }
  0x4e   :  { %135 = vst.msk [vmem:[#allocation7] sm:$0xff] %vm56_vm0, %v133_v9 }
  0x4f   :  { %136 = vst.msk [vmem:[#allocation7 + $0x8] sm:$0xff] %vm56_vm0, %v134_v10 }
  0x50   :  { %149 = dma.vmem_to_hbm [thread:$0]  %s142_s30, 256, %s144_s7, [#allocation4], %s249_s23, %s249_s23, %s250_s24  }
  0x51   :  { %246 = dma.done.wait [#allocation4], 256  }
  0x52   :  { %247 = vsyncadd [#allocation4], 4294967040 }
  0x53   :  { %154 = vsyncpa [#allocation3], 1 }
  0x54   :  { %155 = vsyncpa [#allocation6], 1 }
  0x55   :  { %156 = vsyncpa [#allocation4], 1 }

</bundles_post_ra>
